<compile_context>
chip_gen: v7x
topology: tpu7x:2x2x1
jax: 0.10.0
libtpu: 0.0.40
codegen_flags: <defaults>
</compile_context>

<pallas_src>
import jax
import jax.numpy as jnp
from jax.experimental import pallas as pl
from jax.experimental.pallas import tpu as pltpu

MIN_VALUE = 0.005              # module default
LANES = 128
TARGET_BLOCK_BYTES = 4 << 20   # ~4 MiB per block (dtype-aware row count)
MIN_SPLIT_BYTES = 4 << 20      # arrays >= this always get >= 2 blocks (megacore)
VMEM_LIMIT_BYTES = 32 << 20    # explicit: 2*(in+out) 4 MiB buffers + headroom


def _round_up_8(v):
    return ((v + 7) // 8) * 8


def _isrlu_f32(x_f32, min_value):
    # Negative branch: x * rsqrt(1 + x^2)  (EUP rsqrt, free slot under DMA).
    neg_branch = x_f32 * jax.lax.rsqrt(1.0 + x_f32 * x_f32)
    return 1.0 + min_value + jnp.where(x_f32 > 0, x_f32, neg_branch)


def _make_kernel(min_value):
    def kernel(x_ref, o_ref):
        # Compute in f32 regardless of I/O dtype (v5e-safe), cast back on store.
        x = x_ref[...].astype(jnp.float32)
        o_ref[...] = _isrlu_f32(x, min_value).astype(o_ref.dtype)
    return kernel


def _choose_tile_rows(rows, itemsize):
    """Dtype-aware (byte-targeted) block sizing + megacore-friendly splitting."""
    row_bytes = LANES * itemsize
    tr = max(8, (TARGET_BLOCK_BYTES // row_bytes) // 8 * 8)
    if tr >= rows:
        tr = rows  # single full block; equal-to-full-dim is always legal
    total_bytes = rows * row_bytes
    if total_bytes >= MIN_SPLIT_BYTES:
        nblk = pl.cdiv(rows, tr)
        if nblk < 2:
            nblk = 2                      # both v7x TensorCores get work
        elif nblk % 2 == 1 and nblk < 8:
            nblk += 1                     # avoid a ~1/nblk imbalance tail
        tr = min(tr, _round_up_8(pl.cdiv(rows, nblk)))
    return tr


def _isrlu_2d(x2d, min_value):
    rows = x2d.shape[0]
    tr = _choose_tile_rows(rows, x2d.dtype.itemsize)
    grid = (pl.cdiv(rows, tr),)
    return pl.pallas_call(
        _make_kernel(min_value),
        out_shape=jax.ShapeDtypeStruct((rows, LANES), x2d.dtype),
        grid=grid,
        in_specs=[pl.BlockSpec((tr, LANES), lambda i: (i, 0))],
        out_specs=pl.BlockSpec((tr, LANES), lambda i: (i, 0)),
        compiler_params=pltpu.CompilerParams(
            dimension_semantics=("parallel",),
            vmem_limit_bytes=VMEM_LIMIT_BYTES),
    )(x2d)


def inverse_square_root_linear_unit(x, *, min_value=MIN_VALUE):
    """Elementwise ISRLU; any shape / float dtype; native-dtype I/O."""
    orig_shape = x.shape
    orig_dtype = x.dtype
    n = x.size
    x_flat = jnp.ravel(x)

    n_bulk = (n // LANES) * LANES
    if n_bulk == n:
        # Common (128-aligned) case: free reshape, one kernel, no extra passes.
        y2d = _isrlu_2d(x_flat.reshape(n // LANES, LANES), min_value)
        return y2d.reshape(orig_shape)

    # Ragged case: kernel on the aligned bulk, tiny jnp tail (<128 elements).
    pieces = []
    if n_bulk > 0:
        y_bulk = _isrlu_2d(
            x_flat[:n_bulk].reshape(n_bulk // LANES, LANES), min_value)
        pieces.append(y_bulk.reshape(-1))
    tail = x_flat[n_bulk:].astype(jnp.float32)
    pieces.append(_isrlu_f32(tail, min_value).astype(orig_dtype))
    return jnp.concatenate(pieces).reshape(orig_shape)


if __name__ == "__main__":
    key = jax.random.PRNGKey(0)
    k0, k1, k2 = jax.random.split(key, 3)

    def ref_fn(x):
        xf = x.astype(jnp.float32)
        y = 1.0 + MIN_VALUE + jnp.where(xf > 0, xf, xf / jnp.sqrt(1.0 + xf * xf))
        return y.astype(x.dtype)

    # 1) f32, aligned (2*4*16*16 = 2048 elements, multiple of 128).
    x = jax.random.normal(k0, (2, 4, 16, 16), dtype=jnp.float32)
    y = jax.block_until_ready(inverse_square_root_linear_unit(x))
    assert y.shape == x.shape and y.dtype == x.dtype
    assert jnp.allclose(y, ref_fn(x), atol=1e-5, rtol=1e-5)

    # 2) bf16 I/O (f32 compute inside the kernel).
    xb = x.astype(jnp.bfloat16)
    yb = jax.block_until_ready(inverse_square_root_linear_unit(xb))
    assert yb.shape == xb.shape and yb.dtype == jnp.bfloat16
    assert jnp.allclose(yb.astype(jnp.float32), ref_fn(xb).astype(jnp.float32),
                        atol=2e-2, rtol=2e-2)

    # 3) Ragged size (5*77 = 385 = 3*128 + 1): bulk kernel + jnp tail path.
    xr = jax.random.normal(k1, (5, 77), dtype=jnp.float32)
    yr = jax.block_until_ready(inverse_square_root_linear_unit(xr))
    assert yr.shape == xr.shape and yr.dtype == xr.dtype
    assert jnp.allclose(yr, ref_fn(xr), atol=1e-5, rtol=1e-5)

    # 4) Array large enough to trigger the >=2-block megacore split (8 MiB f32).
    xl = jax.random.normal(k2, (1024, 2048), dtype=jnp.float32)
    yl = jax.block_until_ready(inverse_square_root_linear_unit(xl))
    assert yl.shape == xl.shape and yl.dtype == xl.dtype
    assert jnp.allclose(yl, ref_fn(xl), atol=1e-5, rtol=1e-5)

    print("KERNEL_OK")
</pallas_src>

<mosaic_0001>
module attributes {stable_mosaic.version = 11 : i64} {
  func.func @kernel(%arg0: i32, %arg1: memref<16x128xf32, #tpu.memory_space<vmem>>, %arg2: memref<16x128xf32, #tpu.memory_space<vmem>>) attributes {dimension_semantics = [#tpu.dimension_semantics<parallel>], iteration_bounds = array<i64: 1>, scalar_prefetch = 0 : i64, scratch_operands = 0 : i64, tpu.core_type = #tpu.core_type<tc>, window_params = [{transform_indices = @transform_0, window_bounds = array<i64: 16, 128>}, {transform_indices = @transform_1, window_bounds = array<i64: 16, 128>}]} {
    %c0 = arith.constant 0 : index
    %c0_0 = arith.constant 0 : index
    %0 = vector.load %arg1[%c0, %c0_0] : memref<16x128xf32, #tpu.memory_space<vmem>>, vector<16x128xf32>
    %1 = arith.mulf %0, %0 : vector<16x128xf32>
    %cst = arith.constant 1.000000e+00 : f32
    %2 = vector.broadcast %cst : f32 to vector<16x128xf32>
    %3 = arith.addf %2, %1 : vector<16x128xf32>
    %4 = math.rsqrt %3 : vector<16x128xf32>
    %5 = arith.mulf %0, %4 : vector<16x128xf32>
    %cst_1 = arith.constant 0.000000e+00 : f32
    %6 = vector.broadcast %cst_1 : f32 to vector<16x128xf32>
    %7 = arith.cmpf ogt, %0, %6 : vector<16x128xf32>
    %8 = arith.select %7, %0, %5 : vector<16x128xi1>, vector<16x128xf32>
    %cst_2 = arith.constant 1.005000e+00 : f32
    %9 = vector.broadcast %cst_2 : f32 to vector<16x128xf32>
    %10 = arith.addf %9, %8 : vector<16x128xf32>
    %c0_3 = arith.constant 0 : index
    %c0_4 = arith.constant 0 : index
    %11 = vector.load %arg2[%c0_3, %c0_4] : memref<16x128xf32, #tpu.memory_space<vmem>>, vector<16x128xf32>
    tpu.vector_store %arg2[%c0_3, %c0_4], %10 {strides = array<i32>} : memref<16x128xf32, #tpu.memory_space<vmem>>, vector<16x128xf32>,
    return
  }
  func.func @transform_0(%arg0: i32) -> (i32, i32) {
    %c0_i32 = arith.constant 0 : i32
    %c0_i32_0 = arith.constant 0 : i32
    return %arg0, %c0_i32 : i32, i32
  }
  func.func @transform_1(%arg0: i32) -> (i32, i32) {
    %c0_i32 = arith.constant 0 : i32
    %c0_i32_0 = arith.constant 0 : i32
    return %arg0, %c0_i32 : i32, i32
  }
}

</mosaic_0001>

<bundles_post_ra>
// kernel: tpu_custom_call.1
= control target key start
LH: loop header
LB: loop body
LE: loop exit
PB: predicated region body
PF: predicated region fallthrough
CT: control target
= control target key end

     0   :  { %6 = vsyncpa [#allocation3], 0  ;;  %s158_s0 = inlined_call_operand.hbm [shape: f32[16,128], index: 0, kind: input, shape index: {}]   ;;  %s159_s1 = inlined_call_operand.hbm [shape: f32[16,128], index: 1, kind: output, shape index: {}]  }
   0x1   :  { %7 = vsyncpa [#allocation4], 0  ;;  %s114_s6 = smov [#allocation2]   ;;  %s66_s10 = scalar_lea.hbm %s158_s0, 256 }
   0x2   :  { %s13_s7 = sshll.u32 %s114_s6, 4  ;;  %p67_p0 = scmp.ne.s32.totalorder %s158_s0, %s66_s10  ;;  %s14_s7 = int_to_ptr.vmem [resolvable:$true] %s13_s7 }
   0x3   :  { %p70_p1 = scmp.lt.u32.totalorder %s66_s10, %s158_s0 }
   0x5   :  { %p72_p2 = pnand %p70_p1, %p67_p0 }
   0x7   :  { %75 = shalt.err (!%p72_p2)
}
   0x8   :  { %s76_s15 = scalar_lea.vmem %s14_s7, 256  ;;  %p81_p4 = scmp.lt.s32.totalorder %s14_s7, %s14_s7 }
   0x9   :  { %p77_p3 = scmp.ne.s32.totalorder %s14_s7, %s76_s15  ;;  %p82_p5 = scmp.lt.s32.totalorder %s76_s15, %s76_s15 }
   0xb   :  { %p83_p6 = por %p82_p5, %p81_p4 }
   0xd   :  { %p84_p7 = pnand %p83_p6, %p77_p3 }
   0xf   :  { %87 = shalt.err (!%p84_p7)
}
  0x10   :  { %s115_s16 = smov 128   ;;  %s116_s17 = smov 8  }
  0x11   :  { %19 = dma.hbm_to_vmem [thread:$0]  %s158_s0, 256, %s14_s7, [#allocation3], %s115_s16, %s115_s16, %s116_s17  }
  0x12   :  { %110 = dma.done.wait [#allocation3], 256  }
  0x13   :  { %111 = vsyncadd [#allocation3], 4294967040  ;;  %v23_v0 = vld [vmem:[#allocation2] sm:$0xff]  ;;  %v24_v1 = vld [vmem:[#allocation2 + $0x8] sm:$0xff]  ;;  %s117_s20 = smov [#allocation5]  }
  0x14   :  { %v25_v2 = vmul.f32 %v23_v0, %v23_v0  ;;  %v26_v3 = vmul.f32 %v24_v1, %v24_v1  ;;  %vm33_vm0 = vcmp.gt.f32.partialorder %v23_v0, 0.0  ;;  %vm34_vm1 = vcmp.gt.f32.partialorder %v24_v1, 0.0  ;;  %s46_s21 = sshll.u32 %s117_s20, 4  ;;  %s47_s21 = int_to_ptr.vmem [resolvable:$true] %s46_s21 }
  0x15   :  { %s88_s0 = scalar_lea.vmem %s47_s21, 256  ;;  %p93_p9 = scmp.lt.s32.totalorder %s47_s21, %s47_s21 }
  0x16   :  { %v27_v4 = vadd.f32 1.0, %v25_v2  ;;  %v28_v5 = vadd.f32 1.0, %v26_v3  ;;  %p89_p8 = scmp.ne.s32.totalorder %s47_s21, %s88_s0  ;;  %p94_p10 = scmp.lt.s32.totalorder %s88_s0, %s88_s0 }
  0x18   :  { %62 = vrsqrt.f32 %v27_v4  ;;  %p95_p11 = por %p94_p10, %p93_p9 }
  0x19   :  { %64 = vrsqrt.f32 %v28_v5 }
  0x1a   :  { %p96_p12 = pnand %p95_p11, %p89_p8 }
  0x22   :  { %v63_v6 = vpop.eup %62 }
  0x23   :  { %v65_v7 = vpop.eup %64  ;;  %v31_v8 = vmul.f32 %v63_v6, %v23_v0 }
  0x24   :  { %v32_v9 = vmul.f32 %v65_v7, %v24_v1 }
  0x25   :  { %v35_v10 = vsel %vm33_vm0, %v23_v0, %v31_v8 }
  0x26   :  { %v37_v11 = vadd.f32 1.005, %v35_v10  ;;  %v36_v12 = vsel %vm34_vm1, %v24_v1, %v32_v9 }
  0x27   :  { %v38_v13 = vadd.f32 1.005, %v36_v12 }
  0x28   :  { %39 = vst [vmem:[#allocation5] sm:$0xff] %v37_v11 }
  0x29   :  { %40 = vst [vmem:[#allocation5 + $0x8] sm:$0xff] %v38_v13 }
  0x2a   :  { %99 = shalt.err (!%p96_p12)
}
  0x2b   :  { %s100_s24 = scalar_lea.hbm %s159_s1, 256 }
  0x2c   :  { %p101_p13 = scmp.ne.s32.totalorder %s159_s1, %s100_s24  ;;  %p104_p0 = scmp.lt.u32.totalorder %s100_s24, %s159_s1 }
  0x2e   :  { %p106_p1 = pnand %p104_p0, %p101_p13 }
  0x30   :  { %109 = shalt.err (!%p106_p1)
}
  0x31   :  { %52 = dma.vmem_to_hbm [thread:$0]  %s47_s21, 256, %s159_s1, [#allocation4], %s115_s16, %s115_s16, %s116_s17  }
  0x32   :  { %112 = dma.done.wait [#allocation4], 256  }
  0x33   :  { %113 = vsyncadd [#allocation4], 4294967040 }
  0x34   :  { %56 = vsyncpa [#allocation3], 1 }
  0x35   :  { %57 = vsyncpa [#allocation4], 1 }

</bundles_post_ra>
